<compile_context>
chip_gen: v7x
topology: tpu7x:2x2x1
jax: 0.10.0
libtpu: 0.0.40
codegen_flags: <defaults>
</compile_context>

<pallas_src>
import functools
import math

import jax
import jax.numpy as jnp
from jax.experimental import pallas as pl
from jax.experimental.pallas import tpu as pltpu

_HALF_PI = math.pi / 2.0


def _pe_terms(feat, d_model):
    """inv_freq and phase for integer feature indices `feat` (any shape)."""
    two_k = (feat & ~1).astype(jnp.float32)              # even index of the (sin, cos) pair
    inv_freq = jnp.exp(two_k * (-math.log(10000.0) / d_model))
    phase = (feat & 1).astype(jnp.float32) * _HALF_PI    # odd features: cos(x) = sin(x + pi/2)
    return inv_freq, phase


def _pe_add_kernel_3d(x_ref, o_ref, *, d_model, tile_seq):
    """Block = (tile_seq, batch, d_model); PE computed batch-reduced at (ts, 1, D)."""
    i = pl.program_id(0)
    x = x_ref[...]                                            # (ts, B, D)

    # Global sequence position, one batch copy: (ts, 1, D).
    pos = (jax.lax.broadcasted_iota(jnp.int32, (tile_seq, 1, d_model), 0)
           + i * tile_seq).astype(jnp.float32)

    # Per-feature terms, computed once per grid step: (1, 1, D).
    feat = jax.lax.broadcasted_iota(jnp.int32, (1, 1, d_model), 2)
    inv_freq, phase = _pe_terms(feat, d_model)

    pe = jnp.sin(pos * inv_freq + phase)                      # (ts, 1, D) — single sin
    o_ref[...] = x + pe.astype(x.dtype)                       # broadcast over batch


def _pe_add_kernel_2d(x_ref, o_ref, *, d_model, tile_seq):
    """Block = (tile_seq, batch*d_model), lane-dense; feature index = lane % d_model."""
    i = pl.program_id(0)
    x = x_ref[...]                                            # (ts, B*D)
    ts, bd = x.shape

    pos = (jax.lax.broadcasted_iota(jnp.int32, (ts, 1), 0)
           + i * tile_seq).astype(jnp.float32)                # (ts, 1)

    lane = jax.lax.broadcasted_iota(jnp.int32, (1, bd), 1)    # (1, B*D)
    if d_model & (d_model - 1) == 0:                          # power of two: single AND
        feat = lane & (d_model - 1)
    else:
        feat = lane % d_model
    inv_freq, phase = _pe_terms(feat, d_model)                # (1, B*D), periodic over D

    pe = jnp.sin(pos * inv_freq + phase)                      # (ts, B*D)
    o_ref[...] = x + pe.astype(x.dtype)


def _choose_tile_seq(seq_len, row_bytes):
    """Byte-driven tile size: ~2 MiB per buffer copy (~8 MiB total for in+out,
    double-buffered), comfortably under scoped VMEM on v5e (16 MiB) / v6e / v7x (32 MiB)."""
    target_block_bytes = 2 << 20
    t = max(1, target_block_bytes // max(1, row_bytes))
    t = max(8, (t // 8) * 8)                                  # multiple of 8 (sublane) rows
    return seq_len if t >= seq_len else t


def positional_encoding(x, *, dropout_p=0.1, training=False, tile_seq=None):
    """Pallas forward of PositionalEncoding.  x: [seq_len, batch, d_model]."""
    del dropout_p  # identity in eval mode
    assert not training, "only inference-mode (identity dropout) is implemented"
    seq_len, batch, d_model = x.shape
    itemsize = jnp.dtype(x.dtype).itemsize
    row_bytes = batch * d_model * itemsize

    if tile_seq is None:
        tile_seq = _choose_tile_seq(seq_len, row_bytes)
    tile_seq = min(int(tile_seq), seq_len)

    # Lane-dense 2D path when the natural 3D block would pad sublanes (batch not a
    # multiple of 8) or emit masked partial stores (d_model not a multiple of 128).
    use_2d = (batch % 8 != 0) or (d_model % 128 != 0)
    if use_2d and tile_seq != seq_len:
        tile_seq = max(8, (tile_seq // 8) * 8)                # tiled (sublane) dim in 2D layout

    grid = (pl.cdiv(seq_len, tile_seq),)

    # Raise the scoped-VMEM limit only if the pipelined footprint needs it.
    pipelined_bytes = 4 * tile_seq * row_bytes                # (in + out) x double-buffered
    vmem_limit = None
    if pipelined_bytes > (12 << 20):
        vmem_limit = min(int(pipelined_bytes * 2), 56 << 20)  # stay under v7x's 64 MiB VMEM

    # Seq axis stays "parallel" so v7x's two TensorCores can split the loop.
    cparams = pltpu.CompilerParams(dimension_semantics=("parallel",),
                                   vmem_limit_bytes=vmem_limit)

    # NOTE: input_output_aliases={0: 0} would reuse x's HBM buffer (same traffic, less
    # allocator pressure); left off so callers can keep using x afterwards (residuals).

    if use_2d:
        x2 = x.reshape(seq_len, batch * d_model)              # contiguous -> free reshape
        kernel = functools.partial(_pe_add_kernel_2d, d_model=d_model, tile_seq=tile_seq)
        out2 = pl.pallas_call(
            kernel,
            out_shape=jax.ShapeDtypeStruct(x2.shape, x2.dtype),
            grid_spec=pltpu.PrefetchScalarGridSpec(
                num_scalar_prefetch=0,
                grid=grid,
                in_specs=[pl.BlockSpec((tile_seq, batch * d_model), lambda i: (i, 0))],
                out_specs=pl.BlockSpec((tile_seq, batch * d_model), lambda i: (i, 0)),
            ),
            compiler_params=cparams,
        )(x2)
        return out2.reshape(seq_len, batch, d_model)

    kernel = functools.partial(_pe_add_kernel_3d, d_model=d_model, tile_seq=tile_seq)
    return pl.pallas_call(
        kernel,
        out_shape=jax.ShapeDtypeStruct(x.shape, x.dtype),
        grid_spec=pltpu.PrefetchScalarGridSpec(
            num_scalar_prefetch=0,
            grid=grid,
            in_specs=[pl.BlockSpec((tile_seq, batch, d_model), lambda i: (i, 0, 0))],
            out_specs=pl.BlockSpec((tile_seq, batch, d_model), lambda i: (i, 0, 0)),
        ),
        compiler_params=cparams,
    )(x)


def _reference(x):
    """Pure-JAX reference mirroring the PyTorch buffer construction."""
    seq_len, _, d_model = x.shape
    position = jnp.arange(seq_len, dtype=jnp.float32)[:, None]          # (S, 1)
    div_term = jnp.exp(jnp.arange(0, d_model, 2, dtype=jnp.float32)
                       * (-math.log(10000.0) / d_model))                 # (D/2,)
    pe = jnp.zeros((seq_len, d_model), jnp.float32)
    pe = pe.at[:, 0::2].set(jnp.sin(position * div_term))
    pe = pe.at[:, 1::2].set(jnp.cos(position * div_term))
    return x + pe[:, None, :]


if __name__ == "__main__":
    key = jax.random.PRNGKey(0)
    k1, k2 = jax.random.split(key)

    # Small / unaligned shape (exercises the lane-dense 2D path).
    x1 = jax.random.normal(k1, (8, 2, 32), dtype=jnp.float32)
    o1 = jax.block_until_ready(positional_encoding(x1))
    assert o1.shape == x1.shape and o1.dtype == x1.dtype
    assert jnp.allclose(o1, _reference(x1), atol=1e-5, rtol=1e-5), "2D path mismatch"

    # Aligned batch/d_model (exercises the 3D batch-reduced path).
    x2 = jax.random.normal(k2, (16, 8, 128), dtype=jnp.float32)
    o2 = jax.block_until_ready(positional_encoding(x2))
    assert o2.shape == x2.shape and o2.dtype == x2.dtype
    assert jnp.allclose(o2, _reference(x2), atol=1e-5, rtol=1e-5), "3D path mismatch"

    print("KERNEL_OK")
</pallas_src>

<mosaic_0001>
module attributes {stable_mosaic.version = 11 : i64} {
  func.func @_pe_add_kernel_2d(%arg0: i32, %arg1: memref<8x64xf32, #tpu.memory_space<vmem>>, %arg2: memref<8x64xf32, #tpu.memory_space<vmem>>) attributes {dimension_semantics = [#tpu.dimension_semantics<parallel>], iteration_bounds = array<i64: 1>, scalar_prefetch = 0 : i64, scratch_operands = 0 : i64, tpu.core_type = #tpu.core_type<tc>, window_params = [{transform_indices = @transform_0, window_bounds = array<i64: 8, 64>}, {transform_indices = @transform_1, window_bounds = array<i64: 8, 64>}]} {
    %c0 = arith.constant 0 : index
    %c0_0 = arith.constant 0 : index
    %0 = vector.load %arg1[%c0, %c0_0] : memref<8x64xf32, #tpu.memory_space<vmem>>, vector<8x64xf32>
    %1 = tpu.iota {dimensions = array<i32: 0>} : vector<8x1xi32>
    %c8_i32 = arith.constant 8 : i32
    %2 = arith.muli %arg0, %c8_i32 : i32
    %3 = vector.broadcast %2 : i32 to vector<8x1xi32>
    %4 = arith.addi %1, %3 : vector<8x1xi32>
    %5 = arith.sitofp %4 : vector<8x1xi32> to vector<8x1xf32>
    %6 = tpu.iota {dimensions = array<i32: 1>} : vector<1x64xi32>
    %c31_i32 = arith.constant 31 : i32
    %7 = vector.broadcast %c31_i32 : i32 to vector<1x64xi32>
    %8 = arith.andi %6, %7 : vector<1x64xi32>
    %c-2_i32 = arith.constant -2 : i32
    %9 = vector.broadcast %c-2_i32 : i32 to vector<1x64xi32>
    %10 = arith.andi %8, %9 : vector<1x64xi32>
    %11 = arith.sitofp %10 : vector<1x64xi32> to vector<1x64xf32>
    %cst = arith.constant -0.287823141 : f32
    %12 = vector.broadcast %cst : f32 to vector<1x64xf32>
    %13 = arith.mulf %11, %12 : vector<1x64xf32>
    %14 = math.exp %13 : vector<1x64xf32>
    %c1_i32 = arith.constant 1 : i32
    %15 = vector.broadcast %c1_i32 : i32 to vector<1x64xi32>
    %16 = arith.andi %8, %15 : vector<1x64xi32>
    %17 = arith.sitofp %16 : vector<1x64xi32> to vector<1x64xf32>
    %cst_1 = arith.constant 1.57079637 : f32
    %18 = vector.broadcast %cst_1 : f32 to vector<1x64xf32>
    %19 = arith.mulf %17, %18 : vector<1x64xf32>
    %20 = vector.broadcast %5 : vector<8x1xf32> to vector<8x64xf32>
    %21 = vector.broadcast %14 : vector<1x64xf32> to vector<8x64xf32>
    %22 = arith.mulf %20, %21 : vector<8x64xf32>
    %23 = vector.broadcast %19 : vector<1x64xf32> to vector<8x64xf32>
    %24 = arith.addf %22, %23 : vector<8x64xf32>
    %25 = math.sin %24 : vector<8x64xf32>
    %26 = arith.addf %0, %25 : vector<8x64xf32>
    %c0_2 = arith.constant 0 : index
    %c0_3 = arith.constant 0 : index
    %27 = vector.load %arg2[%c0_2, %c0_3] : memref<8x64xf32, #tpu.memory_space<vmem>>, vector<8x64xf32>
    tpu.vector_store %arg2[%c0_2, %c0_3], %26 {strides = array<i32>} : memref<8x64xf32, #tpu.memory_space<vmem>>, vector<8x64xf32>,
    return
  }
  func.func @transform_0(%arg0: i32) -> (i32, i32) {
    %c0_i32 = arith.constant 0 : i32
    %c0_i32_0 = arith.constant 0 : i32
    return %arg0, %c0_i32 : i32, i32
  }
  func.func @transform_1(%arg0: i32) -> (i32, i32) {
    %c0_i32 = arith.constant 0 : i32
    %c0_i32_0 = arith.constant 0 : i32
    return %arg0, %c0_i32 : i32, i32
  }
}

</mosaic_0001>

<bundles_post_ra>
// kernel: tpu_custom_call.1
= control target key start
LH: loop header
LB: loop body
LE: loop exit
PB: predicated region body
PF: predicated region fallthrough
CT: control target
= control target key end

     0   :  { %6 = vsyncpa [#allocation3], 0  ;;  %s296_s0 = inlined_call_operand.hbm [shape: f32[8,64], index: 0, kind: input, shape index: {}]   ;;  %s297_s1 = inlined_call_operand.hbm [shape: f32[8,64], index: 1, kind: output, shape index: {}]  }
   0x1   :  { %7 = vsyncpa [#allocation4], 0  ;;  %s233_s6 = smov [#allocation2]   ;;  %s185_s10 = scalar_lea.hbm %s296_s0, 128 }
   0x2   :  { %s14_s7 = sshll.u32 %s233_s6, 4  ;;  %p186_p0 = scmp.ne.s32.totalorder %s296_s0, %s185_s10  ;;  %s15_s7 = int_to_ptr.vmem [resolvable:$true] %s14_s7 }
   0x3   :  { %p189_p1 = scmp.lt.u32.totalorder %s185_s10, %s296_s0 }
   0x5   :  { %p191_p2 = pnand %p189_p1, %p186_p0 }
   0x7   :  { %194 = shalt.err (!%p191_p2)
}
   0x8   :  { %s195_s15 = scalar_lea.vmem %s15_s7, 128  ;;  %p200_p4 = scmp.lt.s32.totalorder %s15_s7, %s15_s7 }
   0x9   :  { %p196_p3 = scmp.ne.s32.totalorder %s15_s7, %s195_s15  ;;  %p201_p5 = scmp.lt.s32.totalorder %s195_s15, %s195_s15 }
   0xb   :  { %p202_p6 = por %p201_p5, %p200_p4 }
   0xd   :  { %p203_p7 = pnand %p202_p6, %p196_p3 }
   0xf   :  { %206 = shalt.err (!%p203_p7)
}
  0x10   :  { %17 = dma.hbm_to_vmem [thread:$0]  %s296_s0, 128, %s15_s7, [#allocation3]  }
  0x11   :  { %229 = dma.done.wait [#allocation3], 128  }
  0x12   :  { %230 = vsyncadd [#allocation3], 4294967168  ;;  %v22_v0 = vlaneseq  ;;  %v234_v26 = vmov 683565275   ;;  %v235_v28 = vmov 2475754826  }
  0x13   :  { %v236_v30 = vmov 2131351028   ;;  %v237_v32 = vmov 2102212464   ;;  %v238_v34 = vmov 920167782  }
  0x14   :  { %v29_v1 = vand.u32 127, %v22_v0  ;;  %v23_v8 = vshrl.u32 %v22_v0, 7  ;;  %v239_v41 = vmov 1326507024   ;;  %s240_s0 = smov [#allocation5]   ;;  %vm146_vm13 = vcmask 523264  }
  0x15   :  { %s154_s18 = sshll.u32 %s240_s0, 4  ;;  %s155_s18 = int_to_ptr.vmem [resolvable:$true] %s154_s18 }
  0x16   :  { %v30_v2 = vand.u32 31, %v29_v1  ;;  %v27_v10 = vcvt.s32.f32 %v23_v8  ;;  %s207_s19 = scalar_lea.vmem %s155_s18, 128  ;;  %p212_p9 = scmp.lt.s32.totalorder %s155_s18, %s155_s18 }
  0x17   :  { %p208_p8 = scmp.ne.s32.totalorder %s155_s18, %s207_s19  ;;  %p213_p10 = scmp.lt.s32.totalorder %s207_s19, %s207_s19 }
  0x18   :  { %v31_v3 = vand.u32 4294967294, %v30_v2  ;;  %v36_v7 = vand.u32 1, %v30_v2 }
  0x19   :  { %p214_p11 = por %p213_p10, %p212_p9 }
  0x1a   :  { %v32_v4 = vcvt.s32.f32 %v31_v3  ;;  %v37_v9 = vcvt.s32.f32 %v36_v7 }
  0x1b   :  { %p215_p12 = pnand %p214_p11, %p208_p8 }
  0x1c   :  { %v33_v5 = vmul.f32 -0.28782314, %v32_v4  ;;  %v38_v11 = vmul.f32 1.5707964, %v37_v9 }
  0x1e   :  { %v34_v6 = vmul.f32 1.442695, %v33_v5 }
  0x20   :  { %179 = vpow2.f32 %v34_v6 }
  0x2a   :  { %v180_v12 = vpop.eup %179 }
  0x2b   :  { %v39_v13 = vmul.f32 %v180_v12, %v27_v10 }
  0x2d   :  { %v263_v14 = vadd.f32 %v39_v13, %v38_v11 }
  0x2f   :  { %v44_v15 = vand.u32 2139095040, %v263_v14  ;;  %v41_v17 = vand.u32 2147483647, %v263_v14  ;;  %vm43_vm7 = vcmp.lt.s32.totalorder %v263_v14, 0  ;;  %vm133_vm12 = vweird.f32 %v263_v14 }
  0x31   :  { %v45_v16 = vshrl.u32 %v44_v15, 23  ;;  %v48_v20 = vand.u32 8388607, %v41_v17  ;;  %vm42_vm8 = vcmp.le.f32.partialorder %v41_v17, 0.7853982 }
  0x33   :  { %v163_v18 = vadd.s32 4294967169, %v45_v16  ;;  %v49_v23 = vor.u32 8388608, %v48_v20 }
  0x35   :  { %v51_v19 = vadd.s32 1, %v163_v18  ;;  %v89_v43 = vshll.u32 %v49_v23, 8 }
  0x37   :  { %vm52_vm0 = vcmp.gt.s32.totalorder %v51_v19, 0 }
  0x38   :  { %v53_v21 = vsel %vm52_vm0, %v51_v19, 0 }
  0x39   :  { %v55_v22 = vand.u32 31, %v53_v21  ;;  %v54_v24 = vshrl.u32 %v53_v21, 5 }
  0x3b   :  { %v56_v25 = vsub.s32 32, %v55_v22  ;;  %v58_v27 = vshll.u32 %v234_v26, %v55_v22  ;;  %v61_v29 = vshll.u32 %v235_v28, %v55_v22  ;;  %v64_v31 = vshll.u32 %v236_v30, %v55_v22 }
  0x3c   :  { %v67_v33 = vshll.u32 %v237_v32, %v55_v22  ;;  %v70_v35 = vshll.u32 %v238_v34, %v55_v22  ;;  %vm73_vm1 = vcmp.lt.s32.totalorder %v54_v24, 1  ;;  %vm76_vm2 = vcmp.lt.s32.totalorder %v54_v24, 4 }
  0x3d   :  { %v57_v36 = vshrl.u32 %v234_v26, %v56_v25  ;;  %v59_v37 = vshrl.u32 %v235_v28, %v56_v25  ;;  %v62_v38 = vshrl.u32 %v236_v30, %v56_v25  ;;  %v65_v39 = vshrl.u32 %v237_v32, %v56_v25 }
  0x3e   :  { %v68_v40 = vshrl.u32 %v238_v34, %v56_v25  ;;  %v71_v42 = vshrl.u32 %v239_v41, %v56_v25  ;;  %vm74_vm3 = vcmp.lt.s32.totalorder %v54_v24, 2  ;;  %vm75_vm4 = vcmp.lt.s32.totalorder %v54_v24, 3 }
  0x3f   :  { %v60_v44 = vor.u32 %v59_v37, %v58_v27  ;;  %v63_v45 = vor.u32 %v62_v38, %v61_v29  ;;  %v66_v46 = vor.u32 %v65_v39, %v64_v31 }
  0x40   :  { %v69_v47 = vor.u32 %v68_v40, %v67_v33  ;;  %v72_v48 = vor.u32 %v71_v42, %v70_v35  ;;  %v21_v40 = vld [vmem:[#allocation2] sm:$0xff] }
  0x41   :  { %v77_v49 = vsel %vm73_vm1, %v57_v36, %v60_v44  ;;  %v78_v50 = vsel %vm76_vm2, %v66_v46, 2102212464  ;;  %v81_v51 = vsel %vm73_vm1, %v60_v44, %v63_v45  ;;  %v85_v52 = vsel %vm73_vm1, %v63_v45, %v66_v46 }
  0x42   :  { %v79_v53 = vsel %vm75_vm4, %v63_v45, %v78_v50  ;;  %v82_v54 = vsel %vm76_vm2, %v69_v47, 920167782  ;;  %v86_v55 = vsel %vm76_vm2, %v72_v48, 1326507024 }
  0x43   :  { %v83_v56 = vsel %vm75_vm4, %v66_v46, %v82_v54  ;;  %v87_v57 = vsel %vm75_vm4, %v69_v47, %v86_v55  ;;  %v80_v58 = vsel %vm74_vm3, %v77_v49, %v79_v53 }
  0x44   :  { %v84_v59 = vsel %vm74_vm3, %v81_v51, %v83_v56  ;;  %v88_v60 = vsel %vm74_vm3, %v85_v52, %v87_v57  ;;  %v96_v1 = vmul.u32 %v89_v43, %v80_v58 }
  0x45   :  { %v269_v61 = vmul.u32.u64.low %v89_v43, %v88_v60  ;;  %v270_v62 = vmul.u32.u64.high %v89_v43, %v88_v60, %v269_v61  ;;  %v272_v63 = vmul.u32.u64.low %v89_v43, %v84_v59  ;;  %v273_v0 = vmul.u32.u64.high %v89_v43, %v84_v59, %v272_v63 }
  0x47   :  { %vm98_vm5 = vc.u32 %v270_v62, %v272_v63  ;;  %v99_v2 = vadd.s32 1, %v273_v0  ;;  %v97_v13 = vadd.s32 %v272_v63, %v270_v62 }
  0x49   :  { %v100_v3 = vsel %vm98_vm5, %v99_v2, %v273_v0 }
  0x4a   :  { %v101_v4 = vadd.s32 %v100_v3, %v96_v1 }
  0x4c   :  { %v102_v5 = vadd.s32 536870912, %v101_v4 }
  0x4e   :  { %v103_v6 = vshrl.u32 %v102_v5, 30 }
  0x50   :  { %v104_v7 = vshll.u32 %v103_v6, 30  ;;  %v127_v27 = vsub.s32 4, %v103_v6 }
  0x52   :  { %v105_v8 = vsub.s32 %v101_v4, %v104_v7  ;;  %v128_v30 = vsel %vm43_vm7, %v127_v27, %v103_v6 }
  0x53   :  { %v130_v33 = vsel %vm42_vm8, 0, %v128_v30 }
  0x54   :  { %v107_v9 = vsub.s32 0, %v105_v8  ;;  %v134_v34 = vadd.s32 3, %v130_v33 }
  0x56   :  { %v164_v10 = vmin.u32 %v107_v9, %v105_v8  ;;  %v135_v35 = vand.u32 3, %v134_v34 }
  0x58   :  { %v109_v11 = vclz %v164_v10  ;;  %vm140_vm9 = vcmp.eq.s32.totalorder %v135_v35, 2  ;;  %vm137_vm10 = vcmp.eq.s32.totalorder %v135_v35, 0  ;;  %vm136_vm11 = vcmp.lt.s32.totalorder %v135_v35, 2 }
  0x5a   :  { %v165_v12 = vadd.s32 4294967294, %v109_v11 }
  0x5c   :  { %vm166_vm6 = vcmp.lt.s32.totalorder %v165_v12, 0 }
  0x5d   :  { %v112_v15 = vsel %vm166_vm6, 0, %v165_v12 }
  0x5e   :  { %v113_v16 = vsub.s32 32, %v112_v15  ;;  %v114_v18 = vshll.u32 %v105_v8, %v112_v15  ;;  %v117_v19 = vsub.s32 4294967266, %v112_v15 }
  0x60   :  { %v115_v20 = vshrl.u32 %v97_v13, %v113_v16  ;;  %v118_v21 = vadd.s32 127, %v117_v19 }
  0x62   :  { %v116_v22 = vor.u32 %v115_v20, %v114_v18  ;;  %v119_v23 = vshll.u32 %v118_v21, 23 }
  0x64   :  { %v120_v24 = vor.u32 4788187, %v119_v23  ;;  %v123_v25 = vcvt.s32.f32 %v116_v22 }
  0x66   :  { %v121_v26 = vand.u32 2147483647, %v120_v24 }
  0x68   :  { %v124_v28 = vmul.f32 %v123_v25, %v121_v26 }
  0x6a   :  { %v125_v29 = vxor.u32 2147483648, %v124_v28 }
  0x6c   :  { %v126_v31 = vsel %vm43_vm7, %v125_v29, %v124_v28 }
  0x6d   :  { %v129_v32 = vsel %vm42_vm8, %v263_v14, %v126_v31 }
  0x6e   :  { %181 = vcosq.f32 %v129_v32 }
  0x6f   :  { %183 = vsinq.f32 %v129_v32 }
  0x78   :  { %v182_v36 = vpop.eup %181 }
  0x79   :  { %v184_v37 = vpop.eup %183  ;;  %v141_v38 = vxor.u32 2147483648, %v182_v36 }
  0x7a   :  { %v138_v39 = vxor.u32 2147483648, %v184_v37 }
  0x7b   :  { %v142_v17 = vsel %vm140_vm9, %v141_v38, %v184_v37 }
  0x7c   :  { %v139_v41 = vsel %vm137_vm10, %v182_v36, %v138_v39 }
  0x7d   :  { %v143_v42 = vsel %vm136_vm11, %v139_v41, %v142_v17 }
  0x7e   :  { %v144_v43 = vsel %vm133_vm12, nan, %v143_v42 }
  0x7f   :  { %v145_v44 = vadd.f32 %v144_v43, %v21_v40 }
  0x81   :  { %147 = vst.msk [vmem:[#allocation5] sm:$0xff] %vm146_vm13, %v145_v44 }
  0x82   :  { %218 = shalt.err (!%p215_p12)
}
  0x83   :  { %s219_s22 = scalar_lea.hbm %s297_s1, 128 }
  0x84   :  { %p220_p13 = scmp.ne.s32.totalorder %s297_s1, %s219_s22  ;;  %p223_p0 = scmp.lt.u32.totalorder %s219_s22, %s297_s1 }
  0x86   :  { %p225_p1 = pnand %p223_p0, %p220_p13 }
  0x88   :  { %228 = shalt.err (!%p225_p1)
}
  0x89   :  { %157 = dma.vmem_to_hbm [thread:$0]  %s155_s18, 128, %s297_s1, [#allocation4]  }
  0x8a   :  { %231 = dma.done.wait [#allocation4], 128  }
  0x8b   :  { %232 = vsyncadd [#allocation4], 4294967168 }
  0x8c   :  { %161 = vsyncpa [#allocation3], 1 }
  0x8d   :  { %162 = vsyncpa [#allocation4], 1 }

</bundles_post_ra>
